<compile_context>
chip_gen: v5e
topology: v5e:2x2
jax: 0.10.0
libtpu: 0.0.40
codegen_flags: <defaults>
</compile_context>

<pallas_src>
import functools

import jax
import jax.numpy as jnp
from jax import lax
from jax.experimental import pallas as pl
from jax.experimental.pallas import tpu as pltpu


# ----------------------------------------------------------------------------
# Parameter packing: one (rows_pad, cols_pad) f32 slab, columns laid out below.
# ----------------------------------------------------------------------------
def _param_layout(C_in, C_mid, C_out, use_conv4):
    entries = [('s1', 1), ('b1', 1), ('w1', C_in),
               ('s2', 1), ('b2', 1), ('w2', 9 * C_mid),
               ('s3', 1), ('b3', 1), ('w3', C_mid)]
    if use_conv4:
        entries.append(('w4', C_in))
    offs, c = {}, 0
    for name, width in entries:
        offs[name] = c
        c += width
    return offs, c


def _tree_sum(terms):
    """Pairwise (log-depth) sum -> independent FMA chains for the VLIW bundle."""
    terms = list(terms)
    while len(terms) > 1:
        nxt = [terms[i] + terms[i + 1] for i in range(0, len(terms) - 1, 2)]
        if len(terms) % 2:
            nxt.append(terms[-1])
        terms = nxt
    return terms[0]


def _pick_batch_per_step(N, HW, max_lanes=32768):
    """Batch elements per grid step.

    Prefer an even number of grid steps (v7x: both TensorCores busy), with the
    largest per-step batch among those; otherwise fall back to a single step
    (v5e/v6e: fewest serial steps). Step count always divides N exactly.
    """
    nb_cap = max(1, max_lanes // HW)
    best_even, best_one = None, None
    for nb in range(1, min(N, nb_cap) + 1):
        if N % nb:
            continue
        steps = N // nb
        if steps % 2 == 0:
            best_even = nb
        elif steps == 1:
            best_one = nb
    if best_even is not None:
        return best_even
    if best_one is not None:
        return best_one
    return 1


# ----------------------------------------------------------------------------
# Kernel
# ----------------------------------------------------------------------------
def _resblock_kernel(x_ref, p_ref, o_ref, pad_ref, *,
                     C_in, C_mid, C_out, H, W, pad, use_conv4):
    HW = H * W
    off, _ = _param_layout(C_in, C_mid, C_out, use_conv4)
    p = p_ref[...]                                    # (rows_pad, cols_pad) f32

    def col(base, j=0, *, rows):
        # (1, rows, 1) column of the packed slab, broadcast along batch & lanes
        return p[:rows, base + j:base + j + 1][None]

    x = x_ref[...].astype(jnp.float32)                # (Nb, C_in, HW)

    # ---- bn1 + relu --------------------------------------------------------
    out1 = jnp.maximum(
        x * col(off['s1'], rows=C_in) + col(off['b1'], rows=C_in), 0.0)

    # ---- conv1 (1x1, no bias): unrolled VPU broadcast-FMAs, tree-summed ----
    h = _tree_sum([col(off['w1'], ci, rows=C_mid) * out1[:, ci:ci + 1, :]
                   for ci in range(C_in)])            # (Nb, C_mid, HW)

    # ---- bn2 + relu --------------------------------------------------------
    a = jnp.maximum(
        h * col(off['s2'], rows=C_mid) + col(off['b2'], rows=C_mid), 0.0)

    # ---- conv2 (3x3, pad=1, stride=1), lane-dense on flattened spatial -----
    # Zero only the two halos (interior is fully overwritten by `a`); the halo
    # width `pad` >= W+1 and is a 128 multiple so stores stay lane-aligned.
    zeros_halo = jnp.zeros(pad_ref.shape[:2] + (pad,), jnp.float32)
    pad_ref[:, :, :pad] = zeros_halo
    pad_ref[:, :, pad + HW:] = zeros_halo
    pad_ref[:, :, pad:pad + HW] = a

    # Width-edge masks, hoisted out of the tap loop (kh/ci invariant).
    colx = lax.broadcasted_iota(jnp.int32, (1, 1, HW), 2) % W
    valid_l = colx >= 1          # dw = -1 taps valid
    valid_r = colx < (W - 1)     # dw = +1 taps valid

    w2o = off['w2']
    partials = []                # one unmasked partial sum per dw
    for dw in (-1, 0, 1):
        terms = []
        for kh in range(3):
            start = pad + (kh - 1) * W + dw           # static offset
            if kh == 1 and dw == 0:
                tap = a                                # center: skip the scratch
            else:
                tap = pad_ref[:, :, start:start + HW]  # (Nb, C_mid, HW)
            for ci in range(C_mid):
                widx = w2o + ci * 9 + kh * 3 + (dw + 1)
                terms.append(col(widx, rows=C_mid) * tap[:, ci:ci + 1, :])
        partials.append(_tree_sum(terms))

    h2 = (partials[1]
          + jnp.where(valid_l, partials[0], 0.0)
          + jnp.where(valid_r, partials[2], 0.0))      # (Nb, C_mid, HW)

    # ---- bn3 + relu --------------------------------------------------------
    a2 = jnp.maximum(
        h2 * col(off['s3'], rows=C_mid) + col(off['b3'], rows=C_mid), 0.0)

    # ---- conv3 (1x1, no bias) ----------------------------------------------
    out = _tree_sum([col(off['w3'], cm, rows=C_out) * a2[:, cm:cm + 1, :]
                     for cm in range(C_mid)])          # (Nb, C_out, HW)

    # ---- residual ----------------------------------------------------------
    if use_conv4:
        res = _tree_sum([col(off['w4'], ci, rows=C_out) * out1[:, ci:ci + 1, :]
                         for ci in range(C_in)])
    else:
        res = x                                        # identity shortcut

    o_ref[...] = (out + res).astype(o_ref.dtype)


# ----------------------------------------------------------------------------
# Wrapper
# ----------------------------------------------------------------------------
def residual_block(x, params, *, stride=1, eps=1e-5):
    """Fused ResidualBlock forward (eval-mode BatchNorm).

    x: (N, C_in, H, W) float32 (NCHW, same as PyTorch)
    params: dict with
      'bn1','bn2','bn3': (gamma, beta, running_mean, running_var)
      'w1': (C_mid, C_in, 1, 1)   'w2': (C_mid, C_mid, 3, 3)
      'w3': (C_out, C_mid, 1, 1)  'w4': (C_out, C_in, 1, 1)
    """
    # TODO(synk): stride > 1 (downsampling conv2/conv4) not implemented in the Pallas path.
    assert stride == 1, "only stride=1 supported"

    N, C_in, H, W = x.shape
    HW = H * W
    w1 = jnp.asarray(params['w1'], jnp.float32).reshape(params['w1'].shape[0], C_in)
    C_mid = w1.shape[0]
    w2 = jnp.asarray(params['w2'], jnp.float32).reshape(C_mid, C_mid * 9)
    w3 = jnp.asarray(params['w3'], jnp.float32).reshape(params['w3'].shape[0], C_mid)
    C_out = w3.shape[0]
    use_conv4 = (C_in != C_out) or (stride != 1)

    def bn_fold(gamma, beta, mean, var):
        scale = gamma / jnp.sqrt(var + eps)
        shift = beta - mean * scale
        return (scale.reshape(-1, 1).astype(jnp.float32),
                shift.reshape(-1, 1).astype(jnp.float32))

    s1, b1 = bn_fold(*params['bn1'])
    s2, b2 = bn_fold(*params['bn2'])
    s3, b3 = bn_fold(*params['bn3'])

    # ---- pack all params into one lane-padded f32 slab (single DMA) --------
    pieces = [s1, b1, w1, s2, b2, w2, s3, b3, w3]
    if use_conv4:
        pieces.append(jnp.asarray(params['w4'], jnp.float32).reshape(C_out, C_in))
    _, n_cols = _param_layout(C_in, C_mid, C_out, use_conv4)
    rows_pad = max(8, -(-max(C_in, C_mid, C_out) // 8) * 8)
    cols_pad = -(-n_cols // 128) * 128
    slab = jnp.concatenate(
        [jnp.pad(a, ((0, rows_pad - a.shape[0]), (0, 0))) for a in pieces], axis=1)
    slab = jnp.pad(slab, ((0, 0), (0, cols_pad - slab.shape[1])))

    # ---- blocking -----------------------------------------------------------
    Nb = _pick_batch_per_step(N, HW)
    grid = (N // Nb,)
    x3 = x.reshape(N, C_in, HW)               # free: contiguous NCHW reshape

    # halo width of the flat spatial scratch: >= W+1, rounded to 128 for alignment
    pad = -(-(W + 1) // 128) * 128

    kernel = functools.partial(
        _resblock_kernel, C_in=C_in, C_mid=C_mid, C_out=C_out,
        H=H, W=W, pad=pad, use_conv4=use_conv4)

    out3 = pl.pallas_call(
        kernel,
        out_shape=jax.ShapeDtypeStruct((N, C_out, HW), x.dtype),
        grid_spec=pltpu.PrefetchScalarGridSpec(
            num_scalar_prefetch=0,
            grid=grid,
            in_specs=[
                pl.BlockSpec((Nb, C_in, HW), lambda i: (i, 0, 0)),
                pl.BlockSpec((rows_pad, cols_pad), lambda i: (0, 0)),
            ],
            out_specs=pl.BlockSpec((Nb, C_out, HW), lambda i: (i, 0, 0)),
            scratch_shapes=[pltpu.VMEM((Nb, C_mid, HW + 2 * pad), jnp.float32)],
        ),
        compiler_params=pltpu.CompilerParams(
            dimension_semantics=("parallel",)),
    )(x3, slab)

    return out3.reshape(N, C_out, H, W)


# ----------------------------------------------------------------------------
# Pure-JAX reference (eval-mode BN), mirrors the PyTorch forward.
# ----------------------------------------------------------------------------
def residual_block_reference(x, params, *, stride=1, eps=1e-5):
    def bn(v, gamma, beta, mean, var):
        inv = gamma / jnp.sqrt(var + eps)
        return ((v - mean[None, :, None, None]) * inv[None, :, None, None]
                + beta[None, :, None, None])

    C_in = x.shape[1]
    C_out = params['w3'].shape[0]
    out1 = jax.nn.relu(bn(x, *params['bn1']))
    h = jnp.einsum('nchw,oc->nohw', out1, params['w1'][:, :, 0, 0])
    h = jax.nn.relu(bn(h, *params['bn2']))
    h = jax.lax.conv_general_dilated(
        h, params['w2'], window_strides=(stride, stride),
        padding=((1, 1), (1, 1)),
        dimension_numbers=('NCHW', 'OIHW', 'NCHW'))
    h = jax.nn.relu(bn(h, *params['bn3']))
    out = jnp.einsum('nchw,oc->nohw', h, params['w3'][:, :, 0, 0])
    if C_in != C_out or stride != 1:
        res = jnp.einsum('nchw,oc->nohw', out1, params['w4'][:, :, 0, 0])
        res = res[:, :, ::stride, ::stride]
    else:
        res = x
    return out + res


if __name__ == "__main__":
    key = jax.random.PRNGKey(0)

    def make_params(k, c_in, c_out):
        c_mid = c_out // 4
        ks = jax.random.split(k, 7)

        def bn(kk, c):
            kg, kb, km, kv = jax.random.split(kk, 4)
            return (jax.random.normal(kg, (c,), jnp.float32) * 0.5 + 1.0,
                    jax.random.normal(kb, (c,), jnp.float32) * 0.1,
                    jax.random.normal(km, (c,), jnp.float32) * 0.1,
                    jax.random.uniform(kv, (c,), jnp.float32, 0.5, 1.5))

        def conv_w(kk, co, ci, ksz):
            bound = 1.0 / (ci * ksz * ksz) ** 0.5
            return jax.random.uniform(kk, (co, ci, ksz, ksz), jnp.float32,
                                      -bound, bound)

        return {
            'bn1': bn(ks[0], c_in),
            'w1': conv_w(ks[1], c_mid, c_in, 1),
            'bn2': bn(ks[2], c_mid),
            'w2': conv_w(ks[3], c_mid, c_mid, 3),
            'bn3': bn(ks[4], c_mid),
            'w3': conv_w(ks[5], c_out, c_mid, 1),
            'w4': conv_w(ks[6], c_out, c_in, 1),
        }

    k1, k2, k3, k4, k5 = jax.random.split(key, 5)

    # Case 1: projection residual (C_in != C_out -> conv4 path), stride=1.
    N, C_in, C_out, H, W = 2, 4, 8, 16, 16
    x = jax.random.normal(k1, (N, C_in, H, W), jnp.float32)
    params = make_params(k2, C_in, C_out)
    y = residual_block(x, params)
    jax.block_until_ready(y)
    y_ref = residual_block_reference(x, params)
    assert y.shape == (N, C_out, H, W)
    assert jnp.allclose(y, y_ref, atol=1e-4, rtol=1e-4), \
        float(jnp.max(jnp.abs(y - y_ref)))

    # Case 2: identity residual (C_in == C_out), stride=1.
    C = 8
    x2 = jax.random.normal(k3, (N, C, H, W), jnp.float32)
    params2 = make_params(k4, C, C)
    y2 = residual_block(x2, params2)
    jax.block_until_ready(y2)
    y2_ref = residual_block_reference(x2, params2)
    assert jnp.allclose(y2, y2_ref, atol=1e-4, rtol=1e-4), \
        float(jnp.max(jnp.abs(y2 - y2_ref)))

    # Case 3: larger batch -> exercises the multi-element-per-step (Nb=2) path.
    x3 = jax.random.normal(k5, (4, C_in, H, W), jnp.float32)
    y3 = residual_block(x3, params)
    jax.block_until_ready(y3)
    y3_ref = residual_block_reference(x3, params)
    assert jnp.allclose(y3, y3_ref, atol=1e-4, rtol=1e-4), \
        float(jnp.max(jnp.abs(y3 - y3_ref)))

    print("KERNEL_OK")
</pallas_src>

<mosaic_0001>
module attributes {stable_mosaic.version = 11 : i64} {
  func.func @_resblock_kernel(%arg0: i32, %arg1: memref<1x4x256xf32, #tpu.memory_space<vmem>>, %arg2: memref<8x128xf32, #tpu.memory_space<vmem>>, %arg3: memref<1x8x256xf32, #tpu.memory_space<vmem>>, %arg4: memref<1x2x512xf32, #tpu.memory_space<vmem>>) attributes {dimension_semantics = [#tpu.dimension_semantics<parallel>], iteration_bounds = array<i64: 2>, scalar_prefetch = 0 : i64, scratch_operands = 1 : i64, tpu.core_type = #tpu.core_type<tc>, window_params = [{transform_indices = @transform_0, window_bounds = array<i64: 1, 4, 256>}, {pipeline_mode = #tpu.pipeline_mode<synchronous>, transform_indices = @transform_1, window_bounds = array<i64: 8, 128>}, {transform_indices = @transform_2, window_bounds = array<i64: 1, 8, 256>}]} {
    %c0 = arith.constant 0 : index
    %c0_0 = arith.constant 0 : index
    %0 = vector.load %arg2[%c0, %c0_0] : memref<8x128xf32, #tpu.memory_space<vmem>>, vector<8x128xf32>
    %c0_1 = arith.constant 0 : index
    %c0_2 = arith.constant 0 : index
    %c0_3 = arith.constant 0 : index
    %1 = vector.load %arg1[%c0_1, %c0_2, %c0_3] : memref<1x4x256xf32, #tpu.memory_space<vmem>>, vector<1x4x256xf32>
    %2 = vector.extract_strided_slice %0 {offsets = [0, 0], sizes = [4, 1], strides = [1, 1]} : vector<8x128xf32> to vector<4x1xf32>
    %3 = vector.shape_cast %2 : vector<4x1xf32> to vector<1x4x1xf32>
    %4 = vector.broadcast %3 : vector<1x4x1xf32> to vector<1x4x256xf32>
    %5 = arith.mulf %1, %4 : vector<1x4x256xf32>
    %6 = vector.extract_strided_slice %0 {offsets = [0, 1], sizes = [4, 1], strides = [1, 1]} : vector<8x128xf32> to vector<4x1xf32>
    %7 = vector.shape_cast %6 : vector<4x1xf32> to vector<1x4x1xf32>
    %8 = vector.broadcast %7 : vector<1x4x1xf32> to vector<1x4x256xf32>
    %9 = arith.addf %5, %8 : vector<1x4x256xf32>
    %cst = arith.constant 0.000000e+00 : f32
    %10 = vector.broadcast %cst : f32 to vector<1x4x256xf32>
    %11 = arith.maximumf %9, %10 : vector<1x4x256xf32>
    %12 = vector.extract_strided_slice %0 {offsets = [0, 2], sizes = [2, 1], strides = [1, 1]} : vector<8x128xf32> to vector<2x1xf32>
    %13 = vector.shape_cast %12 : vector<2x1xf32> to vector<1x2x1xf32>
    %14 = vector.extract_strided_slice %11 {offsets = [0, 0, 0], sizes = [1, 1, 256], strides = [1, 1, 1]} : vector<1x4x256xf32> to vector<1x1x256xf32>
    %15 = vector.broadcast %13 : vector<1x2x1xf32> to vector<1x2x256xf32>
    %16 = vector.broadcast %14 : vector<1x1x256xf32> to vector<1x2x256xf32>
    %17 = arith.mulf %15, %16 : vector<1x2x256xf32>
    %18 = vector.extract_strided_slice %0 {offsets = [0, 3], sizes = [2, 1], strides = [1, 1]} : vector<8x128xf32> to vector<2x1xf32>
    %19 = vector.shape_cast %18 : vector<2x1xf32> to vector<1x2x1xf32>
    %20 = vector.extract_strided_slice %11 {offsets = [0, 1, 0], sizes = [1, 1, 256], strides = [1, 1, 1]} : vector<1x4x256xf32> to vector<1x1x256xf32>
    %21 = vector.broadcast %19 : vector<1x2x1xf32> to vector<1x2x256xf32>
    %22 = vector.broadcast %20 : vector<1x1x256xf32> to vector<1x2x256xf32>
    %23 = arith.mulf %21, %22 : vector<1x2x256xf32>
    %24 = vector.extract_strided_slice %0 {offsets = [0, 4], sizes = [2, 1], strides = [1, 1]} : vector<8x128xf32> to vector<2x1xf32>
    %25 = vector.shape_cast %24 : vector<2x1xf32> to vector<1x2x1xf32>
    %26 = vector.extract_strided_slice %11 {offsets = [0, 2, 0], sizes = [1, 1, 256], strides = [1, 1, 1]} : vector<1x4x256xf32> to vector<1x1x256xf32>
    %27 = vector.broadcast %25 : vector<1x2x1xf32> to vector<1x2x256xf32>
    %28 = vector.broadcast %26 : vector<1x1x256xf32> to vector<1x2x256xf32>
    %29 = arith.mulf %27, %28 : vector<1x2x256xf32>
    %30 = vector.extract_strided_slice %0 {offsets = [0, 5], sizes = [2, 1], strides = [1, 1]} : vector<8x128xf32> to vector<2x1xf32>
    %31 = vector.shape_cast %30 : vector<2x1xf32> to vector<1x2x1xf32>
    %32 = vector.extract_strided_slice %11 {offsets = [0, 3, 0], sizes = [1, 1, 256], strides = [1, 1, 1]} : vector<1x4x256xf32> to vector<1x1x256xf32>
    %33 = vector.broadcast %31 : vector<1x2x1xf32> to vector<1x2x256xf32>
    %34 = vector.broadcast %32 : vector<1x1x256xf32> to vector<1x2x256xf32>
    %35 = arith.mulf %33, %34 : vector<1x2x256xf32>
    %36 = arith.addf %17, %23 : vector<1x2x256xf32>
    %37 = arith.addf %29, %35 : vector<1x2x256xf32>
    %38 = arith.addf %36, %37 : vector<1x2x256xf32>
    %39 = vector.extract_strided_slice %0 {offsets = [0, 6], sizes = [2, 1], strides = [1, 1]} : vector<8x128xf32> to vector<2x1xf32>
    %40 = vector.shape_cast %39 : vector<2x1xf32> to vector<1x2x1xf32>
    %41 = vector.broadcast %40 : vector<1x2x1xf32> to vector<1x2x256xf32>
    %42 = arith.mulf %38, %41 : vector<1x2x256xf32>
    %43 = vector.extract_strided_slice %0 {offsets = [0, 7], sizes = [2, 1], strides = [1, 1]} : vector<8x128xf32> to vector<2x1xf32>
    %44 = vector.shape_cast %43 : vector<2x1xf32> to vector<1x2x1xf32>
    %45 = vector.broadcast %44 : vector<1x2x1xf32> to vector<1x2x256xf32>
    %46 = arith.addf %42, %45 : vector<1x2x256xf32>
    %cst_4 = arith.constant 0.000000e+00 : f32
    %47 = vector.broadcast %cst_4 : f32 to vector<1x2x256xf32>
    %48 = arith.maximumf %46, %47 : vector<1x2x256xf32>
    %cst_5 = arith.constant 0.000000e+00 : f32
    %49 = vector.broadcast %cst_5 : f32 to vector<1x2x128xf32>
    %c0_6 = arith.constant 0 : index
    %c0_7 = arith.constant 0 : index
    %c0_8 = arith.constant 0 : index
    %50 = vector.load %arg4[%c0_6, %c0_7, %c0_8] : memref<1x2x512xf32, #tpu.memory_space<vmem>>, vector<1x2x128xf32>
    tpu.vector_store %arg4[%c0_6, %c0_7, %c0_8], %49 {strides = array<i32>} : memref<1x2x512xf32, #tpu.memory_space<vmem>>, vector<1x2x128xf32>,
    %c0_9 = arith.constant 0 : index
    %c0_10 = arith.constant 0 : index
    %c384 = arith.constant 384 : index
    %51 = vector.load %arg4[%c0_9, %c0_10, %c384] : memref<1x2x512xf32, #tpu.memory_space<vmem>>, vector<1x2x128xf32>
    tpu.vector_store %arg4[%c0_9, %c0_10, %c384], %49 {strides = array<i32>} : memref<1x2x512xf32, #tpu.memory_space<vmem>>, vector<1x2x128xf32>,
    %c0_11 = arith.constant 0 : index
    %c0_12 = arith.constant 0 : index
    %c128 = arith.constant 128 : index
    %52 = vector.load %arg4[%c0_11, %c0_12, %c128] : memref<1x2x512xf32, #tpu.memory_space<vmem>>, vector<1x2x256xf32>
    tpu.vector_store %arg4[%c0_11, %c0_12, %c128], %48 {strides = array<i32>} : memref<1x2x512xf32, #tpu.memory_space<vmem>>, vector<1x2x256xf32>,
    %53 = tpu.iota {dimensions = array<i32: 2>} : vector<1x1x256xi32>
    %c16_i32 = arith.constant 16 : i32
    %c0_i32 = arith.constant 0 : i32
    %54 = arith.cmpi eq, %c16_i32, %c0_i32 : i32
    %c1_i32 = arith.constant 1 : i32
    %55 = arith.select %54, %c1_i32, %c16_i32 : i32
    %56 = vector.broadcast %55 : i32 to vector<1x1x256xi32>
    %57 = arith.remsi %53, %56 : vector<1x1x256xi32>
    %c0_i32_13 = arith.constant 0 : i32
    %58 = vector.broadcast %c0_i32_13 : i32 to vector<1x1x256xi32>
    %59 = arith.cmpi ne, %57, %58 : vector<1x1x256xi32>
    %c0_i32_14 = arith.constant 0 : i32
    %60 = vector.broadcast %c0_i32_14 : i32 to vector<1x1x256xi32>
    %61 = arith.cmpi slt, %57, %60 : vector<1x1x256xi32>
    %c0_i32_15 = arith.constant 0 : i32
    %62 = arith.cmpi slt, %55, %c0_i32_15 : i32
    %63 = vector.broadcast %62 : i1 to vector<1x1x256xi1>
    %64 = vector.broadcast %63 : vector<1x1x256xi1> to vector<1x1x256xi1>
    %65 = arith.xori %61, %64 : vector<1x1x256xi1>
    %66 = arith.andi %65, %59 : vector<1x1x256xi1>
    %67 = vector.broadcast %55 : i32 to vector<1x1x256xi32>
    %68 = arith.addi %57, %67 : vector<1x1x256xi32>
    %69 = arith.select %66, %68, %57 : vector<1x1x256xi1>, vector<1x1x256xi32>
    %c1_i32_16 = arith.constant 1 : i32
    %70 = vector.broadcast %c1_i32_16 : i32 to vector<1x1x256xi32>
    %71 = arith.cmpi sge, %69, %70 : vector<1x1x256xi32>
    %c15_i32 = arith.constant 15 : i32
    %72 = vector.broadcast %c15_i32 : i32 to vector<1x1x256xi32>
    %73 = arith.cmpi slt, %69, %72 : vector<1x1x256xi32>
    %c0_17 = arith.constant 0 : index
    %c0_18 = arith.constant 0 : index
    %c111 = arith.constant 111 : index
    %74 = vector.load %arg4[%c0_17, %c0_18, %c111] : memref<1x2x512xf32, #tpu.memory_space<vmem>>, vector<1x2x256xf32>
    %75 = vector.extract_strided_slice %0 {offsets = [0, 8], sizes = [2, 1], strides = [1, 1]} : vector<8x128xf32> to vector<2x1xf32>
    %76 = vector.shape_cast %75 : vector<2x1xf32> to vector<1x2x1xf32>
    %77 = vector.extract_strided_slice %74 {offsets = [0, 0, 0], sizes = [1, 1, 256], strides = [1, 1, 1]} : vector<1x2x256xf32> to vector<1x1x256xf32>
    %78 = vector.broadcast %76 : vector<1x2x1xf32> to vector<1x2x256xf32>
    %79 = vector.broadcast %77 : vector<1x1x256xf32> to vector<1x2x256xf32>
    %80 = arith.mulf %78, %79 : vector<1x2x256xf32>
    %81 = vector.extract_strided_slice %0 {offsets = [0, 17], sizes = [2, 1], strides = [1, 1]} : vector<8x128xf32> to vector<2x1xf32>
    %82 = vector.shape_cast %81 : vector<2x1xf32> to vector<1x2x1xf32>
    %83 = vector.extract_strided_slice %74 {offsets = [0, 1, 0], sizes = [1, 1, 256], strides = [1, 1, 1]} : vector<1x2x256xf32> to vector<1x1x256xf32>
    %84 = vector.broadcast %82 : vector<1x2x1xf32> to vector<1x2x256xf32>
    %85 = vector.broadcast %83 : vector<1x1x256xf32> to vector<1x2x256xf32>
    %86 = arith.mulf %84, %85 : vector<1x2x256xf32>
    %c0_19 = arith.constant 0 : index
    %c0_20 = arith.constant 0 : index
    %c127 = arith.constant 127 : index
    %87 = vector.load %arg4[%c0_19, %c0_20, %c127] : memref<1x2x512xf32, #tpu.memory_space<vmem>>, vector<1x2x256xf32>
    %88 = vector.extract_strided_slice %0 {offsets = [0, 11], sizes = [2, 1], strides = [1, 1]} : vector<8x128xf32> to vector<2x1xf32>
    %89 = vector.shape_cast %88 : vector<2x1xf32> to vector<1x2x1xf32>
    %90 = vector.extract_strided_slice %87 {offsets = [0, 0, 0], sizes = [1, 1, 256], strides = [1, 1, 1]} : vector<1x2x256xf32> to vector<1x1x256xf32>
    %91 = vector.broadcast %89 : vector<1x2x1xf32> to vector<1x2x256xf32>
    %92 = vector.broadcast %90 : vector<1x1x256xf32> to vector<1x2x256xf32>
    %93 = arith.mulf %91, %92 : vector<1x2x256xf32>
    %94 = vector.extract_strided_slice %0 {offsets = [0, 20], sizes = [2, 1], strides = [1, 1]} : vector<8x128xf32> to vector<2x1xf32>
    %95 = vector.shape_cast %94 : vector<2x1xf32> to vector<1x2x1xf32>
    %96 = vector.extract_strided_slice %87 {offsets = [0, 1, 0], sizes = [1, 1, 256], strides = [1, 1, 1]} : vector<1x2x256xf32> to vector<1x1x256xf32>
    %97 = vector.broadcast %95 : vector<1x2x1xf32> to vector<1x2x256xf32>
    %98 = vector.broadcast %96 : vector<1x1x256xf32> to vector<1x2x256xf32>
    %99 = arith.mulf %97, %98 : vector<1x2x256xf32>
    %c0_21 = arith.constant 0 : index
    %c0_22 = arith.constant 0 : index
    %c143 = arith.constant 143 : index
    %100 = vector.load %arg4[%c0_21, %c0_22, %c143] : memref<1x2x512xf32, #tpu.memory_space<vmem>>, vector<1x2x256xf32>
    %101 = vector.extract_strided_slice %0 {offsets = [0, 14], sizes = [2, 1], strides = [1, 1]} : vector<8x128xf32> to vector<2x1xf32>
    %102 = vector.shape_cast %101 : vector<2x1xf32> to vector<1x2x1xf32>
    %103 = vector.extract_strided_slice %100 {offsets = [0, 0, 0], sizes = [1, 1, 256], strides = [1, 1, 1]} : vector<1x2x256xf32> to vector<1x1x256xf32>
    %104 = vector.broadcast %102 : vector<1x2x1xf32> to vector<1x2x256xf32>
    %105 = vector.broadcast %103 : vector<1x1x256xf32> to vector<1x2x256xf32>
    %106 = arith.mulf %104, %105 : vector<1x2x256xf32>
    %107 = vector.extract_strided_slice %0 {offsets = [0, 23], sizes = [2, 1], strides = [1, 1]} : vector<8x128xf32> to vector<2x1xf32>
    %108 = vector.shape_cast %107 : vector<2x1xf32> to vector<1x2x1xf32>
    %109 = vector.extract_strided_slice %100 {offsets = [0, 1, 0], sizes = [1, 1, 256], strides = [1, 1, 1]} : vector<1x2x256xf32> to vector<1x1x256xf32>
    %110 = vector.broadcast %108 : vector<1x2x1xf32> to vector<1x2x256xf32>
    %111 = vector.broadcast %109 : vector<1x1x256xf32> to vector<1x2x256xf32>
    %112 = arith.mulf %110, %111 : vector<1x2x256xf32>
    %113 = arith.addf %80, %86 : vector<1x2x256xf32>
    %114 = arith.addf %93, %99 : vector<1x2x256xf32>
    %115 = arith.addf %106, %112 : vector<1x2x256xf32>
    %116 = arith.addf %113, %114 : vector<1x2x256xf32>
    %117 = arith.addf %116, %115 : vector<1x2x256xf32>
    %c0_23 = arith.constant 0 : index
    %c0_24 = arith.constant 0 : index
    %c112 = arith.constant 112 : index
    %118 = vector.load %arg4[%c0_23, %c0_24, %c112] : memref<1x2x512xf32, #tpu.memory_space<vmem>>, vector<1x2x256xf32>
    %119 = vector.extract_strided_slice %0 {offsets = [0, 9], sizes = [2, 1], strides = [1, 1]} : vector<8x128xf32> to vector<2x1xf32>
    %120 = vector.shape_cast %119 : vector<2x1xf32> to vector<1x2x1xf32>
    %121 = vector.extract_strided_slice %118 {offsets = [0, 0, 0], sizes = [1, 1, 256], strides = [1, 1, 1]} : vector<1x2x256xf32> to vector<1x1x256xf32>
    %122 = vector.broadcast %120 : vector<1x2x1xf32> to vector<1x2x256xf32>
    %123 = vector.broadcast %121 : vector<1x1x256xf32> to vector<1x2x256xf32>
    %124 = arith.mulf %122, %123 : vector<1x2x256xf32>
    %125 = vector.extract_strided_slice %0 {offsets = [0, 18], sizes = [2, 1], strides = [1, 1]} : vector<8x128xf32> to vector<2x1xf32>
    %126 = vector.shape_cast %125 : vector<2x1xf32> to vector<1x2x1xf32>
    %127 = vector.extract_strided_slice %118 {offsets = [0, 1, 0], sizes = [1, 1, 256], strides = [1, 1, 1]} : vector<1x2x256xf32> to vector<1x1x256xf32>
    %128 = vector.broadcast %126 : vector<1x2x1xf32> to vector<1x2x256xf32>
    %129 = vector.broadcast %127 : vector<1x1x256xf32> to vector<1x2x256xf32>
    %130 = arith.mulf %128, %129 : vector<1x2x256xf32>
    %131 = vector.extract_strided_slice %0 {offsets = [0, 12], sizes = [2, 1], strides = [1, 1]} : vector<8x128xf32> to vector<2x1xf32>
    %132 = vector.shape_cast %131 : vector<2x1xf32> to vector<1x2x1xf32>
    %133 = vector.extract_strided_slice %48 {offsets = [0, 0, 0], sizes = [1, 1, 256], strides = [1, 1, 1]} : vector<1x2x256xf32> to vector<1x1x256xf32>
    %134 = vector.broadcast %132 : vector<1x2x1xf32> to vector<1x2x256xf32>
    %135 = vector.broadcast %133 : vector<1x1x256xf32> to vector<1x2x256xf32>
    %136 = arith.mulf %134, %135 : vector<1x2x256xf32>
    %137 = vector.extract_strided_slice %0 {offsets = [0, 21], sizes = [2, 1], strides = [1, 1]} : vector<8x128xf32> to vector<2x1xf32>
    %138 = vector.shape_cast %137 : vector<2x1xf32> to vector<1x2x1xf32>
    %139 = vector.extract_strided_slice %48 {offsets = [0, 1, 0], sizes = [1, 1, 256], strides = [1, 1, 1]} : vector<1x2x256xf32> to vector<1x1x256xf32>
    %140 = vector.broadcast %138 : vector<1x2x1xf32> to vector<1x2x256xf32>
    %141 = vector.broadcast %139 : vector<1x1x256xf32> to vector<1x2x256xf32>
    %142 = arith.mulf %140, %141 : vector<1x2x256xf32>
    %c0_25 = arith.constant 0 : index
    %c0_26 = arith.constant 0 : index
    %c144 = arith.constant 144 : index
    %143 = vector.load %arg4[%c0_25, %c0_26, %c144] : memref<1x2x512xf32, #tpu.memory_space<vmem>>, vector<1x2x256xf32>
    %144 = vector.extract_strided_slice %0 {offsets = [0, 15], sizes = [2, 1], strides = [1, 1]} : vector<8x128xf32> to vector<2x1xf32>
    %145 = vector.shape_cast %144 : vector<2x1xf32> to vector<1x2x1xf32>
    %146 = vector.extract_strided_slice %143 {offsets = [0, 0, 0], sizes = [1, 1, 256], strides = [1, 1, 1]} : vector<1x2x256xf32> to vector<1x1x256xf32>
    %147 = vector.broadcast %145 : vector<1x2x1xf32> to vector<1x2x256xf32>
    %148 = vector.broadcast %146 : vector<1x1x256xf32> to vector<1x2x256xf32>
    %149 = arith.mulf %147, %148 : vector<1x2x256xf32>
    %150 = vector.extract_strided_slice %0 {offsets = [0, 24], sizes = [2, 1], strides = [1, 1]} : vector<8x128xf32> to vector<2x1xf32>
    %151 = vector.shape_cast %150 : vector<2x1xf32> to vector<1x2x1xf32>
    %152 = vector.extract_strided_slice %143 {offsets = [0, 1, 0], sizes = [1, 1, 256], strides = [1, 1, 1]} : vector<1x2x256xf32> to vector<1x1x256xf32>
    %153 = vector.broadcast %151 : vector<1x2x1xf32> to vector<1x2x256xf32>
    %154 = vector.broadcast %152 : vector<1x1x256xf32> to vector<1x2x256xf32>
    %155 = arith.mulf %153, %154 : vector<1x2x256xf32>
    %156 = arith.addf %124, %130 : vector<1x2x256xf32>
    %157 = arith.addf %136, %142 : vector<1x2x256xf32>
    %158 = arith.addf %149, %155 : vector<1x2x256xf32>
    %159 = arith.addf %156, %157 : vector<1x2x256xf32>
    %160 = arith.addf %159, %158 : vector<1x2x256xf32>
    %c0_27 = arith.constant 0 : index
    %c0_28 = arith.constant 0 : index
    %c113 = arith.constant 113 : index
    %161 = vector.load %arg4[%c0_27, %c0_28, %c113] : memref<1x2x512xf32, #tpu.memory_space<vmem>>, vector<1x2x256xf32>
    %162 = vector.extract_strided_slice %0 {offsets = [0, 10], sizes = [2, 1], strides = [1, 1]} : vector<8x128xf32> to vector<2x1xf32>
    %163 = vector.shape_cast %162 : vector<2x1xf32> to vector<1x2x1xf32>
    %164 = vector.extract_strided_slice %161 {offsets = [0, 0, 0], sizes = [1, 1, 256], strides = [1, 1, 1]} : vector<1x2x256xf32> to vector<1x1x256xf32>
    %165 = vector.broadcast %163 : vector<1x2x1xf32> to vector<1x2x256xf32>
    %166 = vector.broadcast %164 : vector<1x1x256xf32> to vector<1x2x256xf32>
    %167 = arith.mulf %165, %166 : vector<1x2x256xf32>
    %168 = vector.extract_strided_slice %0 {offsets = [0, 19], sizes = [2, 1], strides = [1, 1]} : vector<8x128xf32> to vector<2x1xf32>
    %169 = vector.shape_cast %168 : vector<2x1xf32> to vector<1x2x1xf32>
    %170 = vector.extract_strided_slice %161 {offsets = [0, 1, 0], sizes = [1, 1, 256], strides = [1, 1, 1]} : vector<1x2x256xf32> to vector<1x1x256xf32>
    %171 = vector.broadcast %169 : vector<1x2x1xf32> to vector<1x2x256xf32>
    %172 = vector.broadcast %170 : vector<1x1x256xf32> to vector<1x2x256xf32>
    %173 = arith.mulf %171, %172 : vector<1x2x256xf32>
    %c0_29 = arith.constant 0 : index
    %c0_30 = arith.constant 0 : index
    %c129 = arith.constant 129 : index
    %174 = vector.load %arg4[%c0_29, %c0_30, %c129] : memref<1x2x512xf32, #tpu.memory_space<vmem>>, vector<1x2x256xf32>
    %175 = vector.extract_strided_slice %0 {offsets = [0, 13], sizes = [2, 1], strides = [1, 1]} : vector<8x128xf32> to vector<2x1xf32>
    %176 = vector.shape_cast %175 : vector<2x1xf32> to vector<1x2x1xf32>
    %177 = vector.extract_strided_slice %174 {offsets = [0, 0, 0], sizes = [1, 1, 256], strides = [1, 1, 1]} : vector<1x2x256xf32> to vector<1x1x256xf32>
    %178 = vector.broadcast %176 : vector<1x2x1xf32> to vector<1x2x256xf32>
    %179 = vector.broadcast %177 : vector<1x1x256xf32> to vector<1x2x256xf32>
    %180 = arith.mulf %178, %179 : vector<1x2x256xf32>
    %181 = vector.extract_strided_slice %0 {offsets = [0, 22], sizes = [2, 1], strides = [1, 1]} : vector<8x128xf32> to vector<2x1xf32>
    %182 = vector.shape_cast %181 : vector<2x1xf32> to vector<1x2x1xf32>
    %183 = vector.extract_strided_slice %174 {offsets = [0, 1, 0], sizes = [1, 1, 256], strides = [1, 1, 1]} : vector<1x2x256xf32> to vector<1x1x256xf32>
    %184 = vector.broadcast %182 : vector<1x2x1xf32> to vector<1x2x256xf32>
    %185 = vector.broadcast %183 : vector<1x1x256xf32> to vector<1x2x256xf32>
    %186 = arith.mulf %184, %185 : vector<1x2x256xf32>
    %c0_31 = arith.constant 0 : index
    %c0_32 = arith.constant 0 : index
    %c145 = arith.constant 145 : index
    %187 = vector.load %arg4[%c0_31, %c0_32, %c145] : memref<1x2x512xf32, #tpu.memory_space<vmem>>, vector<1x2x256xf32>
    %188 = vector.extract_strided_slice %0 {offsets = [0, 16], sizes = [2, 1], strides = [1, 1]} : vector<8x128xf32> to vector<2x1xf32>
    %189 = vector.shape_cast %188 : vector<2x1xf32> to vector<1x2x1xf32>
    %190 = vector.extract_strided_slice %187 {offsets = [0, 0, 0], sizes = [1, 1, 256], strides = [1, 1, 1]} : vector<1x2x256xf32> to vector<1x1x256xf32>
    %191 = vector.broadcast %189 : vector<1x2x1xf32> to vector<1x2x256xf32>
    %192 = vector.broadcast %190 : vector<1x1x256xf32> to vector<1x2x256xf32>
    %193 = arith.mulf %191, %192 : vector<1x2x256xf32>
    %194 = vector.extract_strided_slice %0 {offsets = [0, 25], sizes = [2, 1], strides = [1, 1]} : vector<8x128xf32> to vector<2x1xf32>
    %195 = vector.shape_cast %194 : vector<2x1xf32> to vector<1x2x1xf32>
    %196 = vector.extract_strided_slice %187 {offsets = [0, 1, 0], sizes = [1, 1, 256], strides = [1, 1, 1]} : vector<1x2x256xf32> to vector<1x1x256xf32>
    %197 = vector.broadcast %195 : vector<1x2x1xf32> to vector<1x2x256xf32>
    %198 = vector.broadcast %196 : vector<1x1x256xf32> to vector<1x2x256xf32>
    %199 = arith.mulf %197, %198 : vector<1x2x256xf32>
    %200 = arith.addf %167, %173 : vector<1x2x256xf32>
    %201 = arith.addf %180, %186 : vector<1x2x256xf32>
    %202 = arith.addf %193, %199 : vector<1x2x256xf32>
    %203 = arith.addf %200, %201 : vector<1x2x256xf32>
    %204 = arith.addf %203, %202 : vector<1x2x256xf32>
    %cst_33 = arith.constant 0.000000e+00 : f32
    %205 = vector.shape_cast %71 : vector<1x1x256xi1> to vector<1x1x256xi1>
    %206 = vector.broadcast %205 : vector<1x1x256xi1> to vector<1x2x256xi1>
    %207 = vector.broadcast %cst_33 : f32 to vector<1x2x256xf32>
    %208 = arith.select %206, %117, %207 : vector<1x2x256xi1>, vector<1x2x256xf32>
    %209 = arith.addf %160, %208 : vector<1x2x256xf32>
    %cst_34 = arith.constant 0.000000e+00 : f32
    %210 = vector.shape_cast %73 : vector<1x1x256xi1> to vector<1x1x256xi1>
    %211 = vector.broadcast %210 : vector<1x1x256xi1> to vector<1x2x256xi1>
    %212 = vector.broadcast %cst_34 : f32 to vector<1x2x256xf32>
    %213 = arith.select %211, %204, %212 : vector<1x2x256xi1>, vector<1x2x256xf32>
    %214 = arith.addf %209, %213 : vector<1x2x256xf32>
    %215 = vector.extract_strided_slice %0 {offsets = [0, 26], sizes = [2, 1], strides = [1, 1]} : vector<8x128xf32> to vector<2x1xf32>
    %216 = vector.shape_cast %215 : vector<2x1xf32> to vector<1x2x1xf32>
    %217 = vector.broadcast %216 : vector<1x2x1xf32> to vector<1x2x256xf32>
    %218 = arith.mulf %214, %217 : vector<1x2x256xf32>
    %219 = vector.extract_strided_slice %0 {offsets = [0, 27], sizes = [2, 1], strides = [1, 1]} : vector<8x128xf32> to vector<2x1xf32>
    %220 = vector.shape_cast %219 : vector<2x1xf32> to vector<1x2x1xf32>
    %221 = vector.broadcast %220 : vector<1x2x1xf32> to vector<1x2x256xf32>
    %222 = arith.addf %218, %221 : vector<1x2x256xf32>
    %cst_35 = arith.constant 0.000000e+00 : f32
    %223 = vector.broadcast %cst_35 : f32 to vector<1x2x256xf32>
    %224 = arith.maximumf %222, %223 : vector<1x2x256xf32>
    %225 = vector.extract_strided_slice %0 {offsets = [0, 28], sizes = [8, 1], strides = [1, 1]} : vector<8x128xf32> to vector<8x1xf32>
    %226 = vector.shape_cast %225 : vector<8x1xf32> to vector<1x8x1xf32>
    %227 = vector.extract_strided_slice %224 {offsets = [0, 0, 0], sizes = [1, 1, 256], strides = [1, 1, 1]} : vector<1x2x256xf32> to vector<1x1x256xf32>
    %228 = vector.broadcast %226 : vector<1x8x1xf32> to vector<1x8x256xf32>
    %229 = vector.broadcast %227 : vector<1x1x256xf32> to vector<1x8x256xf32>
    %230 = arith.mulf %228, %229 : vector<1x8x256xf32>
    %231 = vector.extract_strided_slice %0 {offsets = [0, 29], sizes = [8, 1], strides = [1, 1]} : vector<8x128xf32> to vector<8x1xf32>
    %232 = vector.shape_cast %231 : vector<8x1xf32> to vector<1x8x1xf32>
    %233 = vector.extract_strided_slice %224 {offsets = [0, 1, 0], sizes = [1, 1, 256], strides = [1, 1, 1]} : vector<1x2x256xf32> to vector<1x1x256xf32>
    %234 = vector.broadcast %232 : vector<1x8x1xf32> to vector<1x8x256xf32>
    %235 = vector.broadcast %233 : vector<1x1x256xf32> to vector<1x8x256xf32>
    %236 = arith.mulf %234, %235 : vector<1x8x256xf32>
    %237 = arith.addf %230, %236 : vector<1x8x256xf32>
    %238 = vector.extract_strided_slice %0 {offsets = [0, 30], sizes = [8, 1], strides = [1, 1]} : vector<8x128xf32> to vector<8x1xf32>
    %239 = vector.shape_cast %238 : vector<8x1xf32> to vector<1x8x1xf32>
    %240 = vector.extract_strided_slice %11 {offsets = [0, 0, 0], sizes = [1, 1, 256], strides = [1, 1, 1]} : vector<1x4x256xf32> to vector<1x1x256xf32>
    %241 = vector.broadcast %239 : vector<1x8x1xf32> to vector<1x8x256xf32>
    %242 = vector.broadcast %240 : vector<1x1x256xf32> to vector<1x8x256xf32>
    %243 = arith.mulf %241, %242 : vector<1x8x256xf32>
    %244 = vector.extract_strided_slice %0 {offsets = [0, 31], sizes = [8, 1], strides = [1, 1]} : vector<8x128xf32> to vector<8x1xf32>
    %245 = vector.shape_cast %244 : vector<8x1xf32> to vector<1x8x1xf32>
    %246 = vector.extract_strided_slice %11 {offsets = [0, 1, 0], sizes = [1, 1, 256], strides = [1, 1, 1]} : vector<1x4x256xf32> to vector<1x1x256xf32>
    %247 = vector.broadcast %245 : vector<1x8x1xf32> to vector<1x8x256xf32>
    %248 = vector.broadcast %246 : vector<1x1x256xf32> to vector<1x8x256xf32>
    %249 = arith.mulf %247, %248 : vector<1x8x256xf32>
    %250 = vector.extract_strided_slice %0 {offsets = [0, 32], sizes = [8, 1], strides = [1, 1]} : vector<8x128xf32> to vector<8x1xf32>
    %251 = vector.shape_cast %250 : vector<8x1xf32> to vector<1x8x1xf32>
    %252 = vector.extract_strided_slice %11 {offsets = [0, 2, 0], sizes = [1, 1, 256], strides = [1, 1, 1]} : vector<1x4x256xf32> to vector<1x1x256xf32>
    %253 = vector.broadcast %251 : vector<1x8x1xf32> to vector<1x8x256xf32>
    %254 = vector.broadcast %252 : vector<1x1x256xf32> to vector<1x8x256xf32>
    %255 = arith.mulf %253, %254 : vector<1x8x256xf32>
    %256 = vector.extract_strided_slice %0 {offsets = [0, 33], sizes = [8, 1], strides = [1, 1]} : vector<8x128xf32> to vector<8x1xf32>
    %257 = vector.shape_cast %256 : vector<8x1xf32> to vector<1x8x1xf32>
    %258 = vector.extract_strided_slice %11 {offsets = [0, 3, 0], sizes = [1, 1, 256], strides = [1, 1, 1]} : vector<1x4x256xf32> to vector<1x1x256xf32>
    %259 = vector.broadcast %257 : vector<1x8x1xf32> to vector<1x8x256xf32>
    %260 = vector.broadcast %258 : vector<1x1x256xf32> to vector<1x8x256xf32>
    %261 = arith.mulf %259, %260 : vector<1x8x256xf32>
    %262 = arith.addf %243, %249 : vector<1x8x256xf32>
    %263 = arith.addf %255, %261 : vector<1x8x256xf32>
    %264 = arith.addf %262, %263 : vector<1x8x256xf32>
    %265 = arith.addf %237, %264 : vector<1x8x256xf32>
    %c0_36 = arith.constant 0 : index
    %c0_37 = arith.constant 0 : index
    %c0_38 = arith.constant 0 : index
    %266 = vector.load %arg3[%c0_36, %c0_37, %c0_38] : memref<1x8x256xf32, #tpu.memory_space<vmem>>, vector<1x8x256xf32>
    tpu.vector_store %arg3[%c0_36, %c0_37, %c0_38], %265 {strides = array<i32>} : memref<1x8x256xf32, #tpu.memory_space<vmem>>, vector<1x8x256xf32>,
    return
  }
  func.func @transform_0(%arg0: i32) -> (i32, i32, i32) {
    %c0_i32 = arith.constant 0 : i32
    %c0_i32_0 = arith.constant 0 : i32
    %c0_i32_1 = arith.constant 0 : i32
    return %arg0, %c0_i32, %c0_i32_0 : i32, i32, i32
  }
  func.func @transform_1(%arg0: i32) -> (i32, i32) {
    %c0_i32 = arith.constant 0 : i32
    %c0_i32_0 = arith.constant 0 : i32
    %c0_i32_1 = arith.constant 0 : i32
    return %c0_i32, %c0_i32_0 : i32, i32
  }
  func.func @transform_2(%arg0: i32) -> (i32, i32, i32) {
    %c0_i32 = arith.constant 0 : i32
    %c0_i32_0 = arith.constant 0 : i32
    %c0_i32_1 = arith.constant 0 : i32
    return %arg0, %c0_i32, %c0_i32_0 : i32, i32, i32
  }
}

</mosaic_0001>

<bundles_post_ra>
// kernel: tpu_custom_call.1
= control target key start
LH: loop header
LB: loop body
LE: loop exit
PB: predicated region body
PF: predicated region fallthrough
CT: control target
= control target key end

     0   :  { %7 = vsyncpa [#allocation4], 0  ;;  %s1549_s0 = inlined_call_operand.hbm [shape: f32[2,4,256], index: 0, kind: input, shape index: {}]   ;;  %s1550_s1 = inlined_call_operand.hbm [shape: f32[8,128], index: 1, kind: input, shape index: {}]   ;;  %s1551_s2 = inlined_call_operand.hbm [shape: f32[2,8,256], index: 2, kind: output, shape index: {}]  }
   0x1   :  { %9 = vsyncpa [#allocation4 + $0x1], 0 }
   0x2   :  { %10 = vsyncpa [#allocation7], 0 }
   0x3   :  { %11 = vsyncpa [#allocation5], 0 }
   0x4   :  { %13 = vsyncpa [#allocation5 + $0x1], 0  ;;  %s1204_s9 = smov 0   ;;  %s1206_s10 = smov 0  }
   0x5   :  { %s1208_s11 = smov 0   ;;  %s1210_s12 = smov 0  }
   0x6 LB: > { %s1225_s13 = sadd.s32 4294967295, %s1145_s12   ;;  %s864_s14 = sadd.s32 4294967294, %s1145_s12   ;;  %s1145_s12 = sphi %s1210_s12, %s1561_s12   ;;  %s1141_s11 = sphi %s1208_s11, %s1560_s11   ;;  %s1137_s10 = sphi %s1206_s10, %s1559_s10   ;;  %s1133_s9 = sphi %s1204_s9, %s1558_s9  }
   0x7   : > { %p39_p0 = scmp.ne.s32.totalorder %s1137_s10, %s1133_s9  ;;  %p40_p1 = scmp.eq.s32.totalorder %s1225_s13, 0 }
   0x8   : > { %p84_p2 = scmp.eq.s32.totalorder %s1225_s13, 1  ;;  %p90_p3 = scmp.eq.s32.totalorder %s864_s14, 1 }
   0x9   : > { %p1234_p4 = por %p40_p1, %p39_p0  ;;  %p865_p5 = scmp.ge.s32.totalorder %s1145_s12, 1 }
   0xa   : > { %p1239_p6 = por %p90_p3, %p39_p0  ;;  %p97_p7 = scmp.lt.s32.totalorder %s1145_s12, 3 }
   0xb   : > { %s109_s19 = sshll.u32 %s1550_s1, 4  ;;  %s1147_s21 = smov [#allocation6]   ;;  %s110_s19 = int_to_ptr.hbm [resolvable:$true] %s109_s19 }
   0xc   : > { %p1247_p8 = pnand %p865_p5, %p97_p7  ;;  %s111_s22 = sshll.u32 %s1147_s21, 4  ;;  %s112_s22 = int_to_ptr.vmem [resolvable:$true] %s111_s22 }
   0xd   : > { %s1257_s23 = sadd.s32 1, %s1145_s12   ;;  %s26_s24 = sadd.s32 1, %s1141_s11 }
   0xe   : > { %p890_p10 = pneg %p1247_p8  ;;  %s23_s25 = ssub.s32 %s1145_s12, %s1257_s23 }
   0xf   : > { %p24_p12 = scmp.eq.s32.totalorder %s23_s25, 0  ;;  %p33_p13 = scmp.ne.s32.totalorder %s1141_s11, %s1137_s10 }
  0x10   : > { %p891_p11 = pnand %p890_p10, %p40_p1  ;;  %p34_p0 = scmp.eq.s32.totalorder %s1145_s12, 0 }
  0x11   : > { %s1266_s26 = scalar_select %p24_p12, %s1141_s11, %s26_s24  }
  0x12   : > { %893 = dma.hbm_to_vmem [thread:$0]  (!%p891_p11), %s110_s19, 128, %s112_s22, [#allocation7]  }
  0x13   : > { %p1270_p3 = por %p84_p2, %p33_p13  ;;  %p903_p5 = scmp.lt.s32.totalorder %s1145_s12, 2 }
  0x14   : > { %s122_s28 = sand.u32 1, %s1141_s11   ;;  %s880_s29 = sshll.u32 %s1145_s12, 3 }
  0x15   : > { %p35_p7 = por %p34_p0, %p33_p13  ;;  %s868_s30 = sshll.u32 %s122_s28, 3 }
  0x16   : > { %s131_s5 = scalar_lea.hbm %s1549_s0, %s880_s29  ;;  %s126_s7 = scalar_lea.vmem [#allocation3], %s868_s30 }
  0x17   : > { %s133_s6 = sshll.u32 %s131_s5, 4  ;;  %s135_s8 = sshll.u32 %s126_s7, 4  ;;  %s134_s6 = int_to_ptr.hbm [resolvable:$true] %s133_s6  ;;  %s136_s8 = int_to_ptr.vmem [resolvable:$true] %s135_s8 }
  0x18   : > { %p1280_p10 = pnand %p903_p5, %p35_p7  ;;  %s123_s17 = scalar_lea.sflag [#allocation4], %s122_s28 }
  0x19   : > { %s1045_s18 = sshra.s32 %s134_s6, 4  ;;  %s1052_s24 = scalar_lea.hbm %s1549_s0, 16  ;;  %s1046_s18 = int_to_ptr.hbm [resolvable:$true] %s1045_s18 }
  0x1a   : > { %s1047_s19 = scalar_lea.hbm %s1046_s18, 8  ;;  %p1049_p11 = pneg %p1280_p10 }
  0x1b   : > { %p1048_p2 = scmp.ne.s32.totalorder %s1046_s18, %s1047_s19  ;;  %p1053_p0 = scmp.lt.s32.totalorder %s1046_s18, %s1549_s0 }
  0x1c   : > { %p1054_p5 = scmp.lt.s32.totalorder %s1052_s24, %s1047_s19 }
  0x1d   : > { %p1050_p12 = pnand %p1049_p11, %p1048_p2 }
  0x1e   : > { %p1055_p7 = por %p1054_p5, %p1053_p0 }
  0x1f   : > { %p1051_p13 = pneg %p1050_p12 }
  0x21   : > { %p1056_p9 = pnand %p1055_p7, %p1051_p13 }
  0x23   : > { %1059 = shalt.err (!%p1056_p9)
}
  0x24   : > { %897 = dma.hbm_to_vmem [thread:$0]  (!%p1280_p10), %s134_s6, 128, %s136_s8, %s123_s17  }
  0x25   : > { %144 = sbr.rel (%p1247_p8) target bundleno = 734 (0x2de), region = 28  ;;  %s1297_s28 = sand.u32 (!%p1247_p8), 1, %s1137_s10  }
  0x26   : > { %s872_s30 = sshll.u32 (!%p1247_p8), %s1297_s28, 3  ;;  %s147_s3 = scalar_lea.sflag (!%p1247_p8), [#allocation4], %s1297_s28 }
  0x27   : > { %s1301_s4 = scalar_lea.vmem (!%p1247_p8), [#allocation3], %s872_s30 }
  0x2a   : > { %1120 = dma.done.wait (%p1234_p4), %s147_s3, 128  }
  0x2b   : > { %1122 = vsyncadd (%p1234_p4), %s147_s3, 4294967168 }
  0x2c   : > { %1124 = dma.done.wait (%p40_p1), [#allocation7], 128  }
  0x2d   : > { %1126 = vsyncadd (%p40_p1), [#allocation7], 4294967168  ;;  %v1148_v0 = vmov 0.0   ;;  %v1149_v1 = vmov 2   ;;  %v1150_v2 = vmov 0   ;;  %v1151_v3 = vmov 4  }
  0x2e   : > { %268 = vst [vmem:[#allocation2] sm:$0x3] %v1148_v0  ;;  %982 = vset.pattern.permute.xlu1 %v1149_v1  ;;  %980 = vset.pattern.permute.xlu0 %v1150_v2  ;;  %v1311_v4 = vld [vmem:[#allocation6] sm:$0xff]  ;;  %v1152_v5 = vmov 3   ;;  %v1153_v6 = vmov 1   ;;  %v1154_v7 = vmov 5  }
  0x2f   : > { %269 = vst [vmem:[#allocation2 + $0x6] sm:$0x3] %v1148_v0  ;;  %984 = vset.pattern.permute.xlu2 %v1151_v3  ;;  %200 = vperm.xlu1 %982, %v1311_v4   ;;  %v1155_v8 = vmov 6   ;;  %v1156_v9 = vmov 8   ;;  %v1157_v10 = vmov 7   ;;  %v1158_v11 = vmov 17  }
  0x30   : > { %181 = vperm.xlu0 %980, %v1311_v4   ;;  %225 = vperm.xlu2 %984, %v1311_v4   ;;  %v1159_v12 = vmov 23   ;;  %v1160_v13 = vmov 11   ;;  %v1161_v14 = vmov 20   ;;  %v1162_v15 = vmov 10   ;;  %v178_v28 = vld [vmem:[%s1301_s4] sm:$0xff]  ;;  %s1170_s15 = smov 112  }
  0x31   : > { %v1163_v16 = vmov 14   ;;  %v1164_v17 = vmov 13   ;;  %v1165_v18 = vmov 22   ;;  %v1166_v19 = vmov 16   ;;  %s1174_s20 = smov 96   ;;  %s1179_s5 = smov 17  }
  0x32   : > { %v1167_v20 = vmov 25   ;;  %v1168_v21 = vmov 19   ;;  %v1169_v22 = vmov 839922192   ;;  %vm273_vm0 = vcmask 1041408   ;;  %s1180_s6 = smov 15  }
  0x33   : > { %v184_v23 = vunpack.c.l.s4 %v1169_v22  ;;  %vm408_vm1 = vcmask 916480   ;;  %vm426_vm2 = vcmask 785408   ;;  %vm615_vm3 = vcmask 138240   ;;  %s1188_s7 = smov 16   ;;  %s874_s8 = sshll.u32 %s1297_s28, 4 }
  0x34   : > { %vm648_vm6 = vcmask 121856   ;;  %s881_s14 = sshll.u32 %s1225_s13, 4  ;;  %vm760_vm9 = vcmask 130048   ;;  %s176_s21 = scalar_lea.vmem [#allocation8], %s874_s8 }
  0x35   : > { %v185_v25 = vunpack.c.0.s8 %v184_v23  ;;  %s779_s19 = scalar_lea.hbm %s1551_s2, %s881_s14  ;;  %s781_s22 = sshll.u32 %s176_s21, 4  ;;  %s782_s22 = int_to_ptr.vmem [resolvable:$true] %s781_s22 }
  0x36   : > { %s783_s24 = sshll.u32 %s779_s19, 4  ;;  %s768_s25 = scalar_lea.sflag [#allocation5], %s1297_s28  ;;  %s784_s24 = int_to_ptr.hbm [resolvable:$true] %s783_s24 }
  0x37   : > { %983 = vset.pattern.permute.xlu1 %v1152_v5  ;;  %s1089_s13 = sshra.s32 %s784_s24, 4  ;;  %s1095_s4 = scalar_lea.hbm %s1551_s2, 32  ;;  %s1090_s13 = int_to_ptr.hbm [resolvable:$true] %s1089_s13 }
  0x38   : > { %981 = vset.pattern.permute.xlu0 %v1153_v6  ;;  %213 = vperm.xlu1 %983, %v1311_v4   ;;  %s1091_s29 = scalar_lea.hbm %s1090_s13, 16  ;;  %p1096_p9 = scmp.lt.s32.totalorder %s1090_s13, %s1551_s2 }
  0x39   : > { %190 = vperm.xlu0 %981, %v1311_v4   ;;  %985 = vset.pattern.permute.xlu2 %v1154_v7  ;;  %p1092_p1 = scmp.ne.s32.totalorder %s1090_s13, %s1091_s29  ;;  %p1097_p10 = scmp.lt.s32.totalorder %s1095_s4, %s1091_s29 }
  0x3a   : > { %237 = vperm.xlu2 %985, %v1311_v4  }
  0x3b   : > { %p1093_p4 = pnand %p1092_p1, %p1270_p3  ;;  %p1098_p2 = por %p1097_p10, %p1096_p9 }
  0x3d   : > { %p1094_p8 = pneg %p1093_p4 }
  0x3f   : > { %p1099_p11 = pnand %p1098_p2, %p1094_p8 }
  0x40   : > { %986 = vset.pattern.permute.xlu1 %v1155_v8 }
  0x41   : > { %988 = vset.pattern.permute.xlu0 %v1156_v9  ;;  %255 = vperm.xlu1 %986, %v1311_v4  }
  0x42   : > { %310 = vperm.xlu0 %988, %v1311_v4   ;;  %987 = vset.pattern.permute.xlu2 %v1157_v10 }
  0x43   : > { %261 = vperm.xlu2 %987, %v1311_v4  }
  0x49   : > { %989 = vset.pattern.permute.xlu1 %v1158_v11 }
  0x4a   : > { %993 = vset.pattern.permute.xlu0 %v1159_v12  ;;  %327 = vperm.xlu1 %989, %v1311_v4  }
  0x4b   : > { %375 = vperm.xlu0 %993, %v1311_v4   ;;  %990 = vset.pattern.permute.xlu2 %v1160_v13 }
  0x4c   : > { %343 = vperm.xlu2 %990, %v1311_v4  }
  0x52   : > { %991 = vset.pattern.permute.xlu1 %v1161_v14 }
  0x53   : > { %998 = vset.pattern.permute.xlu0 %v1162_v15  ;;  %350 = vperm.xlu1 %991, %v1311_v4  }
  0x54   : > { %518 = vperm.xlu0 %998, %v1311_v4   ;;  %992 = vset.pattern.permute.xlu2 %v1163_v16 }
  0x55   : > { %358 = vperm.xlu2 %992, %v1311_v4  }
  0x5b   : > { %994 = vset.pattern.permute.xlu1 %v1164_v17 }
  0x5c   : > { %532 = vperm.xlu1 %994, %v1311_v4  }
  0x5d   : > { %995 = vset.pattern.permute.xlu2 %v1165_v18 }
  0x5e   : > { %539 = vperm.xlu2 %995, %v1311_v4  }
  0x64   : > { %996 = vset.pattern.permute.xlu1 %v1166_v19 }
  0x65   : > { %546 = vperm.xlu1 %996, %v1311_v4  }
  0x66   : > { %997 = vset.pattern.permute.xlu2 %v1167_v20 }
  0x67   : > { %553 = vperm.xlu2 %997, %v1311_v4  }
  0x6d   : > { %999 = vset.pattern.permute.xlu1 %v1168_v21 }
  0x6e   : > { %525 = vperm.xlu1 %999, %v1311_v4  }
  0x8a   : > { %v226_v29 = vpop.permute.xlu2 %225 }
  0x94   : > { %v238_v44 = vpop.permute.xlu2 %237 }
  0x9d   : > { %v262_v7 = vpop.permute.xlu2 %261 }
  0xa1   : > { %v201_v27 = vpop.permute.xlu1 %200 }
  0xa2   : > { %v182_v24 = vpop.permute.xlu0 %181 }
  0xa3   : > { %v186_v26 = vperm.slane %v182_v24, %v185_v25 }
  0xa5   : > { %v188_v31 = vmul.f32 %v186_v26, %v178_v28 }
  0xa6   : > { %v344_v15 = vpop.permute.xlu2 %343 }
  0xaa   : > { %v214_v35 = vpop.permute.xlu1 %213 }
  0xab   : > { %v191_v30 = vpop.permute.xlu0 %190 }
  0xac   : > { %v195_v32 = vperm.slane %v191_v30, %v185_v25 }
  0xae   : > { %v197_v33 = vadd.f32 %v195_v32, %v188_v31 }
  0xaf   : > { %v1364_v25 = vpop.permute.xlu2 %358 }
  0xb0   : > { %v198_v34 = vmax.f32 %v197_v33, 0.0 }
  0xb2   : > { %v204_v36 = vperm.slane %v198_v34, 0  ;;  %v205_v37 = vperm.slane %v198_v34, 4  ;;  %v216_v38 = vperm.slane %v198_v34, 1  ;;  %v217_v39 = vperm.slane %v198_v34, 5 }
  0xb3   : > { %v228_v40 = vperm.slane %v198_v34, 2  ;;  %v229_v41 = vperm.slane %v198_v34, 6  ;;  %v240_v42 = vperm.slane %v198_v34, 3  ;;  %v241_v43 = vperm.slane %v198_v34, 7  ;;  %v256_v3 = vpop.permute.xlu1 %255 }
  0xb4   : > { %v1334_v45 = vperm.slane %v204_v36, 0  ;;  %v1336_v46 = vperm.slane %v205_v37, 0  ;;  %v1338_v47 = vperm.slane %v216_v38, 1  ;;  %v1340_v48 = vperm.slane %v217_v39, 1 }
  0xb5   : > { %v1342_v49 = vperm.slane %v228_v40, 2  ;;  %v1344_v50 = vperm.slane %v229_v41, 2  ;;  %v1346_v51 = vperm.slane %v240_v42, 3  ;;  %v1348_v52 = vperm.slane %v241_v43, 3 }
  0xb6   : > { %v210_v53 = vmul.f32 %v1334_v45, %v201_v27  ;;  %v211_v54 = vmul.f32 %v1336_v46, %v201_v27  ;;  %v222_v55 = vmul.f32 %v1338_v47, %v214_v35  ;;  %v223_v56 = vmul.f32 %v1340_v48, %v214_v35  ;;  %v311_v27 = vpop.permute.xlu0 %310 }
  0xb7   : > { %v234_v57 = vmul.f32 %v1342_v49, %v226_v29  ;;  %v235_v58 = vmul.f32 %v1344_v50, %v226_v29  ;;  %v246_v59 = vmul.f32 %v1346_v51, %v238_v44  ;;  %v247_v60 = vmul.f32 %v1348_v52, %v238_v44 }
  0xb8   : > { %v248_v61 = vadd.f32 %v222_v55, %v210_v53  ;;  %v249_v62 = vadd.f32 %v223_v56, %v211_v54 }
  0xb9   : > { %v250_v63 = vadd.f32 %v246_v59, %v234_v57  ;;  %v251_v0 = vadd.f32 %v247_v60, %v235_v58 }
  0xbb   : > { %v252_v1 = vadd.f32 %v250_v63, %v248_v61  ;;  %v253_v2 = vadd.f32 %v251_v0, %v249_v62 }
  0xbc   : > { %v328_v14 = vpop.permute.xlu1 %327 }
  0xbd   : > { %v258_v5 = vmul.f32 %v256_v3, %v252_v1  ;;  %v259_v6 = vmul.f32 %v256_v3, %v253_v2  ;;  %v540_v2 = vpop.permute.xlu2 %539 }
  0xbe   : > { %v376_v3 = vpop.permute.xlu0 %375 }
  0xbf   : > { %v264_v8 = vadd.f32 %v262_v7, %v258_v5  ;;  %v265_v9 = vadd.f32 %v262_v7, %v259_v6 }
  0xc1   : > { %v1358_v10 = vmax.f32 %v265_v9, 0.0  ;;  %v1360_v11 = vmax.f32 %v264_v8, 0.0  ;;  %v1171_v8 = vmov 12   ;;  %v1172_v9 = vmov 21  }
  0xc2   : > { %1000 = vset.pattern.permute.xlu0 %v1171_v8  ;;  %1001 = vset.pattern.permute.xlu1 %v1172_v9  ;;  %v1176_v8 = vmov 30   ;;  %v1177_v9 = vmov 31  }
  0xc3   : > { %v272_v12 = vrot.slane %v1358_v10, 6 }
  0xc5   : > { %v274_v13 = vsel %vm273_vm0, %v1360_v11, %v272_v12  ;;  %v351_v21 = vpop.permute.xlu1 %350 }
  0xc6   : > { %276 = vst [vmem:[#allocation2 + $0x2] sm:$0xf] %v274_v13 }
  0xcd   : > { %v308_v16 = vld [vmem:[#allocation2] sm:$0x3f] }
  0xce   : > { %v332_v17 = vperm.slane %v308_v16, 5  ;;  %v330_v18 = vperm.slane %v308_v16, 1  ;;  %v331_v19 = vperm.slane %v308_v16, 3  ;;  %v316_v20 = vperm.slane %v308_v16, 4  ;;  %v356_v22 = vld [vmem:[#allocation2 + $0x2] sm:$0x3f]  ;;  %v533_v59 = vpop.permute.xlu1 %532 }
  0xcf   : > { %v314_v23 = vperm.slane %v308_v16, 0  ;;  %v315_v24 = vperm.slane %v308_v16, 2  ;;  %v362_v30 = vperm.slane %v356_v22, 0  ;;  %v378_v34 = vperm.slane %v356_v22, 1 }
  0xd0   : > { %v1366_v26 = vperm.slane %v332_v17, 1  ;;  %v1368_v28 = vperm.slane %v330_v18, 1  ;;  %v1370_v29 = vperm.slane %v331_v19, 1  ;;  %v1372_v31 = vperm.slane %v316_v20, 0 }
  0xd1   : > { %v1374_v32 = vperm.slane %v314_v23, 0  ;;  %v1376_v33 = vperm.slane %v315_v24, 0  ;;  %v363_v36 = vperm.slane %v356_v22, 2  ;;  %v379_v37 = vperm.slane %v356_v22, 3 }
  0xd2   : > { %v355_v35 = vmul.f32 %v351_v21, %v1366_v26  ;;  %v353_v38 = vmul.f32 %v351_v21, %v1368_v28  ;;  %v354_v39 = vmul.f32 %v351_v21, %v1370_v29  ;;  %v1381_v40 = vperm.slane %v362_v30, 0 }
  0xd3   : > { %v339_v41 = vmul.f32 %v1368_v28, %v328_v14  ;;  %v340_v42 = vmul.f32 %v1370_v29, %v328_v14  ;;  %v348_v43 = vmul.f32 %v344_v15, %v1372_v31  ;;  %v341_v44 = vmul.f32 %v1366_v26, %v328_v14 }
  0xd4   : > { %v1387_v53 = vperm.slane %v378_v34, 1  ;;  %v347_v54 = vmul.f32 %v344_v15, %v1376_v33  ;;  %v346_v55 = vmul.f32 %v344_v15, %v1374_v32  ;;  %v323_v56 = vmul.f32 %v1374_v32, %v311_v27 }
  0xd5   : > { %v324_v57 = vmul.f32 %v1376_v33, %v311_v27  ;;  %v325_v58 = vmul.f32 %v1372_v31, %v311_v27  ;;  %v395_v60 = vadd.f32 %v355_v35, %v348_v43  ;;  %v1394_v61 = vperm.slane %v363_v36, 0  ;;  %v554_v35 = vpop.permute.xlu2 %553 }
  0xd6   : > { %v1396_v62 = vperm.slane %v379_v37, 1  ;;  %v394_v63 = vadd.f32 %v354_v39, %v347_v54  ;;  %v393_v0 = vadd.f32 %v353_v38, %v346_v55  ;;  %v364_v1 = vperm.slane %v356_v22, 4 }
  0xd7   : > { %406 = vrot.lane.b32.xlu2 %v395_v60, %s1170_s15  ;;  %v371_v5 = vmul.f32 %v1381_v40, %v1364_v25  ;;  %v387_v6 = vmul.f32 %v1387_v53, %v376_v3  ;;  %v380_v7 = vperm.slane %v356_v22, 5  ;;  %v1404_v12 = vadd.f32 %v341_v44, %v325_v58  ;;  %v547_v27 = vpop.permute.xlu1 %546 }
  0xd8   : > { %404 = vrot.lane.b32.xlu1 %v394_v63, %s1170_s15  ;;  %402 = vrot.lane.b32.xlu0 %v393_v0, %s1170_s15  ;;  %v1406_v13 = vadd.f32 %v340_v42, %v324_v57  ;;  %v1408_v14 = vadd.f32 %v339_v41, %v323_v56  ;;  %v372_v15 = vmul.f32 %v1394_v61, %v1364_v25  ;;  %v1173_v19 = vmov 15  }
  0xd9   : > { %v542_v16 = vmul.f32 %v540_v2, %v1387_v53  ;;  %v388_v17 = vmul.f32 %v1396_v62, %v376_v3  ;;  %v535_v18 = vmul.f32 %v533_v59, %v1381_v40  ;;  %1002 = vset.pattern.permute.xlu2 %v1173_v19  ;;  %v1415_v20 = vperm.slane %v364_v1, 0  ;;  %v519_v1 = vpop.permute.xlu0 %518 }
  0xda   : > { %v1417_v21 = vperm.slane %v380_v7, 1  ;;  %v396_v22 = vadd.f32 %v387_v6, %v371_v5  ;;  %v543_v36 = vmul.f32 %v540_v2, %v1396_v62  ;;  %v536_v37 = vmul.f32 %v533_v59, %v1394_v61 }
  0xdb   : > { %v562_v23 = vadd.f32 %v542_v16, %v535_v18  ;;  %v397_v24 = vadd.f32 %v388_v17, %v372_v15  ;;  %v373_v30 = vmul.f32 %v1415_v20, %v1364_v25  ;;  %v549_v38 = vmul.f32 %v547_v27, %v1381_v40 }
  0xdc   : > { %v389_v34 = vmul.f32 %v1417_v21, %v376_v3  ;;  %v556_v39 = vmul.f32 %v554_v35, %v1387_v53  ;;  %v563_v43 = vadd.f32 %v543_v36, %v536_v37  ;;  %v544_v25 = vmul.f32 %v540_v2, %v1417_v21 }
  0xdd   : > { %v537_v44 = vmul.f32 %v533_v59, %v1415_v20  ;;  %v550_v54 = vmul.f32 %v547_v27, %v1394_v61  ;;  %v557_v55 = vmul.f32 %v554_v35, %v1396_v62  ;;  %v551_v58 = vmul.f32 %v547_v27, %v1415_v20 }
  0xde   : > { %v398_v41 = vadd.f32 %v389_v34, %v373_v30  ;;  %v565_v42 = vadd.f32 %v556_v39, %v549_v38  ;;  %v558_v60 = vmul.f32 %v554_v35, %v1417_v21  ;;  %v1175_v59 = vmov 24  }
  0xdf   : > { %420 = vrot.lane.b32.xlu2 %v396_v22, %s1174_s20  ;;  %v564_v56 = vadd.f32 %v544_v25, %v537_v44  ;;  %v566_v57 = vadd.f32 %v557_v55, %v550_v54  ;;  %v1178_v16 = vmov 32   ;;  %v521_v35 = vmul.f32 %v519_v1, %v1374_v32 }
  0xe0   : > { %571 = vrot.lane.b32.xlu0 %v562_v23, %s1170_s15  ;;  %422 = vrot.lane.b32.xlu1 %v397_v24, %s1174_s20  ;;  %v567_v63 = vadd.f32 %v558_v60, %v551_v58  ;;  %v526_v2 = vpop.permute.xlu1 %525  ;;  %v522_v25 = vmul.f32 %v519_v1, %v1376_v33  ;;  %v523_v44 = vmul.f32 %v519_v1, %v1372_v31  ;;  %v461_v1 = vperm.slane %v1360_v11, 1 }
  0xe1   : > { %v528_v23 = vmul.f32 %v526_v2, %v1368_v28 }
  0xe3   : > { %v559_v36 = vadd.f32 %v528_v23, %v521_v35 }
  0xe7   : > { %424 = vrot.lane.b32.xlu2 %v398_v41, %s1174_s20  ;;  %v529_v41 = vmul.f32 %v526_v2, %v1370_v29 }
  0xe8   : > { %588 = vrot.lane.b32.xlu0 %v565_v42, %s1174_s20  ;;  %573 = vrot.lane.b32.xlu1 %v563_v43, %s1170_s15  ;;  %v530_v42 = vmul.f32 %v526_v2, %v1366_v26 }
  0xea   : > { %v561_v58 = vadd.f32 %v530_v42, %v523_v44  ;;  %v277_v42 = vlaneseq }
  0xef   : > { %575 = vrot.lane.b32.xlu2 %v564_v56, %s1170_s15 }
  0xf0   : > { %450 = vperm.xlu0 %1000, %v1311_v4   ;;  %590 = vrot.lane.b32.xlu1 %v566_v57, %s1174_s20  ;;  %v560_v57 = vadd.f32 %v529_v41, %v522_v25  ;;  %v1184_v41 = vmov 26  }
  0xf7   : > { %592 = vrot.lane.b32.xlu2 %v567_v63, %s1174_s20 }
  0xf8   : > { %458 = vperm.xlu1 %1001, %v1311_v4   ;;  %1005 = vset.pattern.permute.xlu0 %v1177_v9 }
  0xff   : > { %466 = vperm.xlu2 %1002, %v1311_v4  }
 0x100   : > { %1003 = vset.pattern.permute.xlu1 %v1175_v59 }
 0x101   : > { %473 = vperm.xlu1 %1003, %v1311_v4  }
 0x107   : > { %1004 = vset.pattern.permute.xlu2 %v1176_v8 }
 0x109   : > { %1006 = vset.pattern.permute.xlu1 %v1178_v16 }
 0x131   : > { %v407_v0 = vpop.permute.xlu2 %406 }
 0x132   : > { %v416_v17 = vadd.f32 %v407_v0, %v1404_v12 }
 0x139   : > { %v421_v3 = vpop.permute.xlu2 %420 }
 0x141   : > { %v425_v7 = vpop.permute.xlu2 %424 }
 0x149   : > { %v576_v37 = vpop.permute.xlu2 %575 }
 0x14a   : > { %v405_v5 = vpop.permute.xlu1 %404  ;;  %v403_v6 = vpop.permute.xlu0 %402 }
 0x14b   : > { %v410_v15 = vsel %vm408_vm1, %v405_v5, %v407_v0  ;;  %v409_v43 = vsel %vm408_vm1, %v403_v6, %v405_v5 }
 0x14c   : > { %v415_v18 = vadd.f32 %v410_v15, %v1406_v13  ;;  %v414_v54 = vadd.f32 %v409_v43, %v1408_v14  ;;  %v453_v15 = vperm.slane %v1360_v11, 0  ;;  %v278_v43 = vand.u32 127, %v277_v42 }
 0x14e   : > { %v432_v6 = vadd.f32 %v421_v3, %v414_v54  ;;  %v279_v44 = vadd.s32 128, %v278_v43 }
 0x150   : > { %v291_v54 = vand.u32 15, %v279_v44 }
 0x151   : > { %v593_v60 = vpop.permute.xlu2 %592 }
 0x152   : > { %v423_v19 = vpop.permute.xlu1 %422  ;;  %v572_v22 = vpop.permute.xlu0 %571  ;;  %vm305_vm4 = vcmp.ge.s32.totalorder %v291_v54, 1  ;;  %vm307_vm7 = vcmp.lt.s32.totalorder %v291_v54, 15 }
 0x153   : > { %v427_v24 = vsel %vm426_vm2, %v421_v3, %v423_v19  ;;  %v428_v27 = vsel %vm426_vm2, %v423_v19, %v425_v7  ;;  %v582_v12 = vadd.f32 %v572_v22, %v559_v36 }
 0x154   : > { %v433_v30 = vadd.f32 %v427_v24, %v415_v18  ;;  %v434_v34 = vadd.f32 %v428_v27, %v416_v17  ;;  %v1181_v18 = vmov 33   ;;  %v462_v24 = vperm.slane %v1358_v10, 1 }
 0x155   : > { %v454_v27 = vperm.slane %v1358_v10, 0 }
 0x156   : > { %611 = vrot.lane.b32.xlu0 %v433_v30, %s1179_s5  ;;  %613 = vrot.lane.b32.xlu1 %v434_v34, %s1179_s5 }
 0x159   : > { %v467_v23 = vpop.permute.xlu2 %466 }
 0x15a   : > { %v574_v38 = vpop.permute.xlu1 %573  ;;  %v589_v13 = vpop.permute.xlu0 %588  ;;  %v470_v34 = vmul.f32 %v467_v23, %v1394_v61  ;;  %v469_v10 = vmul.f32 %v467_v23, %v1381_v40 }
 0x15b   : > { %v599_v39 = vadd.f32 %v589_v13, %v582_v12  ;;  %v577_v55 = vsel %vm408_vm1, %v572_v22, %v574_v38  ;;  %v578_v56 = vsel %vm408_vm1, %v574_v38, %v576_v37  ;;  %v1182_v22 = vmov 9  }
 0x15c   : > { %v583_v63 = vadd.f32 %v577_v55, %v560_v57  ;;  %v584_v59 = vadd.f32 %v578_v56, %v561_v58  ;;  %v1183_v12 = vmov 18   ;;  %v1185_v55 = vmov 27  }
 0x15d   : > { %642 = vrot.lane.b32.xlu2 %v599_v39, %s1180_s6 }
 0x162   : > { %v591_v0 = vpop.permute.xlu1 %590  ;;  %v451_v9 = vpop.permute.xlu0 %450 }
 0x163   : > { %v594_v2 = vsel %vm426_vm2, %v589_v13, %v591_v0  ;;  %v595_v5 = vsel %vm426_vm2, %v591_v0, %v593_v60  ;;  %v455_v17 = vmul.f32 %v453_v15, %v451_v9  ;;  %v456_v35 = vmul.f32 %v454_v27, %v451_v9 }
 0x164   : > { %v600_v7 = vadd.f32 %v594_v2, %v583_v63  ;;  %v601_v8 = vadd.f32 %v595_v5, %v584_v59  ;;  %v471_v13 = vmul.f32 %v467_v23, %v1415_v20 }
 0x165   : > { %609 = vrot.lane.b32.xlu2 %v432_v6, %s1179_s5 }
 0x166   : > { %646 = vrot.lane.b32.xlu1 %v601_v8, %s1180_s6  ;;  %644 = vrot.lane.b32.xlu0 %v600_v7, %s1180_s6 }
 0x16a   : > { %v459_v14 = vpop.permute.xlu1 %458 }
 0x16b   : > { %v463_v16 = vmul.f32 %v461_v1, %v459_v14  ;;  %v464_v30 = vmul.f32 %v462_v24, %v459_v14 }
 0x16d   : > { %709 = vperm.xlu2 %1004, %v1311_v4   ;;  %v482_v3 = vadd.f32 %v463_v16, %v455_v17  ;;  %v483_v37 = vadd.f32 %v464_v30, %v456_v35 }
 0x16e   : > { %721 = vperm.xlu1 %1006, %v1311_v4   ;;  %715 = vperm.xlu0 %1005, %v1311_v4  }
 0x173   : > { %v474_v19 = vpop.permute.xlu1 %473 }
 0x174   : > { %v477_v11 = vmul.f32 %v474_v19, %v1396_v62  ;;  %v476_v38 = vmul.f32 %v474_v19, %v1387_v53  ;;  %v478_v62 = vmul.f32 %v474_v19, %v1417_v21  ;;  %v284_v53 = vand.u32 15, %v278_v43 }
 0x175   : > { %1007 = vset.pattern.permute.xlu2 %v1181_v18  ;;  %v1186_v21 = vmov 28  }
 0x176   : > { %1008 = vset.pattern.permute.xlu1 %v1182_v22  ;;  %727 = vperm.xlu2 %1007, %v1311_v4   ;;  %v485_v36 = vadd.f32 %v477_v11, %v470_v34  ;;  %v484_v61 = vadd.f32 %v476_v38, %v469_v10  ;;  %v486_v39 = vadd.f32 %v478_v62, %v471_v13  ;;  %vm304_vm5 = vcmp.ge.s32.totalorder %v284_v53, 1 }
 0x177   : > { %489 = vrot.lane.b32.xlu0 %v482_v3, %s1170_s15  ;;  %436 = vperm.xlu1 %1008, %v1311_v4   ;;  %vm306_vm8 = vcmp.lt.s32.totalorder %v284_v53, 15 }
 0x178   : > { %1010 = vset.pattern.permute.xlu0 %v1184_v41 }
 0x17e   : > { %1009 = vset.pattern.permute.xlu2 %v1183_v12 }
 0x17f   : > { %505 = vrot.lane.b32.xlu0 %v485_v36, %s1174_s20  ;;  %443 = vperm.xlu2 %1009, %v1311_v4  }
 0x180   : > { %491 = vrot.lane.b32.xlu1 %v483_v37, %s1170_s15 }
 0x181   : > { %1011 = vset.pattern.permute.xlu1 %v1185_v55 }
 0x187   : > { %503 = vrot.lane.b32.xlu2 %v484_v61, %s1174_s20 }
 0x188   : > { %507 = vrot.lane.b32.xlu1 %v486_v39, %s1174_s20  ;;  %1012 = vset.pattern.permute.xlu2 %v1186_v21 }
 0x1b7   : > { %v643_v25 = vpop.permute.xlu2 %642 }
 0x1bf   : > { %v610_v40 = vpop.permute.xlu2 %609 }
 0x1c7   : > { %v710_v59 = vpop.permute.xlu2 %709 }
 0x1c8   : > { %v614_v20 = vpop.permute.xlu1 %613  ;;  %v612_v56 = vpop.permute.xlu0 %611  ;;  %v713_v1 = vmul.f32 %v710_v59, %v1336_v46  ;;  %v712_v23 = vmul.f32 %v710_v59, %v1334_v45 }
 0x1c9   : > { %v616_v57 = vsel %vm615_vm3, %v610_v40, %v612_v56  ;;  %v617_v58 = vsel %vm615_vm3, %v612_v56, %v614_v20 }
 0x1ca   : > { %v621_v60 = vsel %vm305_vm4, %v617_v58, 0.0  ;;  %v620_v63 = vsel %vm304_vm5, %v616_v57, 0.0 }
 0x1cb   : > { %626 = vrot.lane.b32.xlu0 %v621_v60, %s1170_s15  ;;  %624 = vrot.lane.b32.xlu2 %v620_v63, %s1170_s15 }
 0x1d0   : > { %v728_v14 = vpop.permute.xlu2 %727 }
 0x1d1   : > { %v731_v9 = vmul.f32 %v728_v14, %v1348_v52 }
 0x1d3   : > { %669 = vperm.xlu0 %1010, %v1311_v4  }
 0x1d8   : > { %v647_v0 = vpop.permute.xlu1 %646  ;;  %v645_v2 = vpop.permute.xlu0 %644 }
 0x1d9   : > { %v649_v5 = vsel %vm648_vm6, %v643_v25, %v645_v2  ;;  %v650_v6 = vsel %vm648_vm6, %v645_v2, %v647_v0 }
 0x1da   : > { %v654_v7 = vsel %vm307_vm7, %v650_v6, 0.0  ;;  %v653_v8 = vsel %vm306_vm8, %v649_v5, 0.0 }
 0x1db   : > { %659 = vrot.lane.b32.xlu2 %v654_v7, %s1170_s15  ;;  %1014 = vset.pattern.permute.xlu0 %v1181_v18  ;;  %v730_v18 = vmul.f32 %v728_v14, %v1346_v51 }
 0x1dc   : > { %657 = vrot.lane.b32.xlu1 %v653_v8, %s1170_s15 }
 0x1e0   : > { %v722_v15 = vpop.permute.xlu1 %721  ;;  %v716_v16 = vpop.permute.xlu0 %715 }
 0x1e1   : > { %v724_v17 = vmul.f32 %v722_v15, %v1342_v49  ;;  %v725_v3 = vmul.f32 %v722_v15, %v1344_v50  ;;  %v718_v19 = vmul.f32 %v716_v16, %v1338_v47  ;;  %v719_v22 = vmul.f32 %v716_v16, %v1340_v48  ;;  %v444_v48 = vpop.permute.xlu2 %443 }
 0x1e2   : > { %v1187_v47 = vmov 29   ;;  %v446_v36 = vmul.f32 %v444_v48, %v1368_v28  ;;  %v447_v12 = vmul.f32 %v444_v48, %v1370_v29  ;;  %v448_v61 = vmul.f32 %v444_v48, %v1366_v26 }
 0x1e3   : > { %v735_v24 = vadd.f32 %v731_v9, %v725_v3  ;;  %v733_v11 = vadd.f32 %v719_v22, %v713_v1  ;;  %686 = vperm.xlu2 %1012, %v1311_v4   ;;  %v734_v46 = vadd.f32 %v730_v18, %v724_v17  ;;  %v732_v52 = vadd.f32 %v718_v19, %v712_v23 }
 0x1e4   : > { %676 = vperm.xlu1 %1011, %v1311_v4  }
 0x1e5   : > { %v737_v27 = vadd.f32 %v735_v24, %v733_v11  ;;  %v736_v49 = vadd.f32 %v734_v46, %v732_v52 }
 0x1e7   : > { %742 = vrot.lane.b32.xlu0 %v737_v27, %s1170_s15 }
 0x1e9   : > { %v437_v45 = vpop.permute.xlu1 %436  ;;  %v490_v50 = vpop.permute.xlu0 %489 }
 0x1ea   : > { %v504_v30 = vpop.permute.xlu2 %503  ;;  %v439_v35 = vmul.f32 %v437_v45, %v1374_v32  ;;  %v440_v37 = vmul.f32 %v437_v45, %v1376_v33  ;;  %v441_v38 = vmul.f32 %v437_v45, %v1372_v31 }
 0x1eb   : > { %740 = vrot.lane.b32.xlu2 %v736_v49, %s1170_s15 }
 0x1ec   : > { %1013 = vset.pattern.permute.xlu1 %v1187_v47  ;;  %v479_v62 = vadd.f32 %v446_v36, %v439_v35  ;;  %v480_v39 = vadd.f32 %v447_v12, %v440_v37  ;;  %v481_v42 = vadd.f32 %v448_v61, %v441_v38 }
 0x1ed   : > { %696 = vperm.xlu1 %1013, %v1311_v4  }
 0x1ee   : > { %v497_v32 = vadd.f32 %v490_v50, %v479_v62 }
 0x1f0   : > { %v514_v44 = vadd.f32 %v504_v30, %v497_v32 }
 0x1f1   : > { %v506_v34 = vpop.permute.xlu0 %505 }
 0x1f2   : > { %v492_v51 = vpop.permute.xlu1 %491  ;;  %v509_v33 = vsel %vm426_vm2, %v504_v30, %v506_v34 }
 0x1f3   : > { %v493_v10 = vsel %vm408_vm1, %v490_v50, %v492_v51  ;;  %v499_v25 = vadd.f32 %v492_v51, %v481_v42 }
 0x1f4   : > { %v498_v43 = vadd.f32 %v493_v10, %v480_v39 }
 0x1f6   : > { %v515_v54 = vadd.f32 %v509_v33, %v498_v43 }
 0x1fa   : > { %v508_v4 = vpop.permute.xlu1 %507 }
 0x1fb   : > { %v510_v28 = vsel %vm426_vm2, %v506_v34, %v508_v4 }
 0x1fc   : > { %v516_v31 = vadd.f32 %v510_v28, %v499_v25 }
 0x225   : > { %v625_v13 = vpop.permute.xlu2 %624 }
 0x226   : > { %v632_v21 = vadd.f32 %v625_v13, %v514_v44 }
 0x235   : > { %v660_v53 = vpop.permute.xlu2 %659 }
 0x23d   : > { %v627_v41 = vpop.permute.xlu0 %626  ;;  %v687_v8 = vpop.permute.xlu2 %686 }
 0x23e   : > { %v628_v29 = vsel %vm408_vm1, %v625_v13, %v627_v41  ;;  %v634_v26 = vadd.f32 %v627_v41, %v516_v31 }
 0x23f   : > { %v633_v40 = vadd.f32 %v628_v29, %v515_v54 }
 0x240   : > { %v667_v60 = vadd.f32 %v660_v53, %v634_v26 }
 0x245   : > { %v670_v58 = vpop.permute.xlu0 %669  ;;  %v741_v47 = vpop.permute.xlu2 %740 }
 0x246   : > { %v674_v63 = vmul.f32 %v670_v58, %v667_v60 }
 0x24e   : > { %v658_v55 = vpop.permute.xlu1 %657 }
 0x24f   : > { %v661_v20 = vsel %vm408_vm1, %v658_v55, %v660_v53  ;;  %v665_v56 = vadd.f32 %v658_v55, %v632_v21 }
 0x250   : > { %v666_v57 = vadd.f32 %v661_v20, %v633_v40 }
 0x251   : > { %v672_v59 = vmul.f32 %v670_v58, %v665_v56 }
 0x252   : > { %v673_v0 = vmul.f32 %v670_v58, %v666_v57 }
 0x256   : > { %v677_v2 = vpop.permute.xlu1 %676 }
 0x257   : > { %v679_v5 = vadd.f32 %v677_v2, %v672_v59  ;;  %v680_v6 = vadd.f32 %v677_v2, %v673_v0  ;;  %v681_v7 = vadd.f32 %v677_v2, %v674_v63 }
 0x259   : > { %v682_v14 = vmax.f32 %v679_v5, 0.0  ;;  %v683_v1 = vmax.f32 %v680_v6, 0.0  ;;  %v684_v9 = vmax.f32 %v681_v7, 0.0  ;;  %v743_v11 = vpop.permute.xlu0 %742 }
 0x25a   : > { %v744_v51 = vsel %vm408_vm1, %v741_v47, %v743_v11 }
 0x25b   : > { %v689_v15 = vperm.slane %v682_v14, 0  ;;  %v690_v16 = vperm.slane %v683_v1, 0  ;;  %v691_v17 = vperm.slane %v684_v9, 0  ;;  %v699_v3 = vperm.slane %v682_v14, 1 }
 0x25c   : > { %v700_v19 = vperm.slane %v683_v1, 1  ;;  %v701_v22 = vperm.slane %v684_v9, 1 }
 0x25d   : > { %v692_v18 = vmul.f32 %v689_v15, %v687_v8  ;;  %v693_v24 = vmul.f32 %v690_v16, %v687_v8  ;;  %v694_v46 = vmul.f32 %v691_v17, %v687_v8 }
 0x25f   : > { %v697_v23 = vpop.permute.xlu1 %696 }
 0x260   : > { %v702_v52 = vmul.f32 %v699_v3, %v697_v23  ;;  %v703_v27 = vmul.f32 %v700_v19, %v697_v23  ;;  %v704_v49 = vmul.f32 %v701_v22, %v697_v23 }
 0x262   : > { %v705_v45 = vadd.f32 %v702_v52, %v692_v18  ;;  %v706_v48 = vadd.f32 %v703_v27, %v693_v24  ;;  %v707_v50 = vadd.f32 %v704_v49, %v694_v46 }
 0x264   : > { %v748_v30 = vadd.f32 %v741_v47, %v705_v45  ;;  %v750_v34 = vadd.f32 %v743_v11, %v707_v50  ;;  %v749_v35 = vadd.f32 %v744_v51, %v706_v48 }
 0x266   : > { %754 = vrot.lane.b32.xlu1 %v748_v30, %s1188_s7  ;;  %758 = vrot.lane.b32.xlu0 %v750_v34, %s1188_s7 }
 0x267   : > { %756 = vrot.lane.b32.xlu2 %v749_v35, %s1188_s7 }
 0x2c1   : > { %v757_v36 = vpop.permute.xlu2 %756 }
 0x2d8   : > { %v755_v37 = vpop.permute.xlu1 %754  ;;  %v759_v12 = vpop.permute.xlu0 %758 }
 0x2d9   : > { %v761_v38 = vsel %vm760_vm9, %v755_v37, %v757_v36  ;;  %v762_v62 = vsel %vm760_vm9, %v757_v36, %v759_v12 }
 0x2da   : > { %765 = vst [vmem:[%s176_s21] sm:$0xff] %v761_v38 }
 0x2db   : > { %766 = vst [vmem:[%s176_s21 + $0x8] sm:$0xff] %v762_v62 }
 0x2dc   : > { %1102 = shalt.err (!%p1099_p11)
}
 0x2dd   : > { %888 = dma.vmem_to_hbm [thread:$0]  (%p1270_p3), %s782_s22, 256, %s784_s24, %s768_s25  }
 0x2de PF: > { %s795_s28 = sand.u32 1, %s1133_s9   ;;  %p1557_p12 = scmp.ge.s32.totalorder %s1145_s12, 2 }
 0x2df   : > { %s796_s5 = scalar_lea.sflag [#allocation5], %s795_s28 }
 0x2e0   : > { %p899_p13 = pnand %p1557_p12, %p1239_p6 }
 0x2e2   : > { %p900_p0 = pneg %p899_p13 }
 0x2e4   : > { %1128 = dma.done.wait (%p900_p0), %s796_s5, 256  }
 0x2e5   : > { %1130 = vsyncadd (%p900_p0), %s796_s5, 4294967040  ;;  %p16_p5 = scmp.ge.s32.totalorder %s1257_s23, 4   ;;  %s1558_s9 = smov %s1137_s10 }
 0x2e6   : > { %s1559_s10 = smov %s1141_s11  ;;  %s1560_s11 = smov %s1266_s26 }
 0x2e7   : > { %s1561_s12 = smov %s1257_s23  ;;  %18 = sbr.rel (!%p16_p5) target bundleno = 6 (0x6), region = 77 }
 0x2ec   :  { %802 = vsyncpa [#allocation4], 1 }
 0x2ed   :  { %804 = vsyncpa [#allocation4 + $0x1], 1 }
 0x2ee   :  { %805 = vsyncpa [#allocation7], 1 }
 0x2ef   :  { %806 = vsyncpa [#allocation5], 1 }
 0x2f0   :  { %808 = vsyncpa [#allocation5 + $0x1], 1 }

</bundles_post_ra>
